<compile_context>
chip_gen: v6e
topology: v6e:2x2x1
jax: 0.10.0
libtpu: 0.0.40
codegen_flags: <defaults>
</compile_context>

<pallas_src>
import functools

import jax
import jax.numpy as jnp
from jax.experimental import pallas as pl
from jax.experimental.pallas import tpu as pltpu

LANE = 128


def _round_up(n, m):
    return ((n + m - 1) // m) * m


# ----------------------------------------------------------------------------
# Fused MLP kernel: out = relu(relu(x @ W1 + b1) @ W2 + b2) @ W3 + b3
# x / W* are bf16, biases f32, MXU accumulation f32, output f32.
# ----------------------------------------------------------------------------
def _mlp_fused_kernel(x_ref, w1_ref, b1_ref, w2_ref, b2_ref, w3_ref, b3_ref,
                      o_ref):
    # x_ref:  (TN, D)                 one batch tile, flattened features (bf16)
    # w*_ref: (D,Hp), (Hp,Hp), (Hp,Cp)  lane-padded weights, (in, out) (bf16)
    # b*_ref: (1,Hp), (1,Hp), (1,Cp)  f32
    # o_ref:  (TN, Cp)                f32
    x = x_ref[...]
    h = jnp.dot(x, w1_ref[...], preferred_element_type=jnp.float32)
    h = jnp.maximum(h + b1_ref[...], 0.0)                      # (TN, Hp) f32
    h = jnp.dot(h.astype(w2_ref.dtype), w2_ref[...],
                preferred_element_type=jnp.float32)
    h = jnp.maximum(h + b2_ref[...], 0.0)                      # (TN, Hp) f32
    out = jnp.dot(h.astype(w3_ref.dtype), w3_ref[...],
                  preferred_element_type=jnp.float32) + b3_ref[...]
    o_ref[...] = out.astype(o_ref.dtype)                       # (TN, Cp) f32


# ----------------------------------------------------------------------------
# One-time parameter prep: pad hidden/class dims to multiples of 128 (zero
# padding is numerically exact through ReLU and the dots) and cast weights to
# bf16.  Biases stay f32 (added after f32 accumulation).
# ----------------------------------------------------------------------------
def prepare_params(params):
    w1, b1, w2, b2, w3, b3 = (params["w1"], params["b1"], params["w2"],
                              params["b2"], params["w3"], params["b3"])
    D, H = w1.shape
    C = w3.shape[1]
    Hp = _round_up(H, LANE)
    Cp = _round_up(C, LANE)

    def pad2(a, rows, cols):
        return jnp.pad(a, ((0, rows - a.shape[0]), (0, cols - a.shape[1])))

    prepared = {
        "w1": pad2(w1, D, Hp).astype(jnp.bfloat16),
        "b1": pad2(b1, 1, Hp).astype(jnp.float32),
        "w2": pad2(w2, Hp, Hp).astype(jnp.bfloat16),
        "b2": pad2(b2, 1, Hp).astype(jnp.float32),
        "w3": pad2(w3, Hp, Cp).astype(jnp.bfloat16),
        "b3": pad2(b3, 1, Cp).astype(jnp.float32),
    }
    return prepared, C


def _choose_tile_n(N, max_tile):
    """Batch tile that (a) divides N (no wrapper-side pad copy of x), (b) is a
    multiple of 8 (sublane aligned), and (c) yields >=2 grid steps when N is
    big enough so both v7x TensorCores get work."""
    if N <= 8:
        return N, False                       # single block == full array dim
    upper = min(max_tile, N // 2)
    for t in range(upper - (upper % 8), 7, -8):
        if N % t == 0:
            return t, False
    if N <= max_tile:
        return N, False                       # single full-array block, no pad
    return max_tile, True                     # ragged fallback: pad x once


def mlp_forward(prepared, num_classes, x, *, max_batch_tile=512):
    """Forward pass matching MLPModel.forward: flatten, fc1+ReLU, fc2+ReLU, fc3."""
    w1, b1, w2, b2, w3, b3 = (prepared["w1"], prepared["b1"], prepared["w2"],
                              prepared["b2"], prepared["w3"], prepared["b3"])
    N = x.shape[0]
    x2 = x.reshape(N, -1).astype(jnp.bfloat16)   # free reshape + bf16 stream
    D = x2.shape[1]
    Hp = w1.shape[1]
    Cp = w3.shape[1]

    tile_n, needs_pad = _choose_tile_n(N, max_batch_tile)
    n_tiles = pl.cdiv(N, tile_n)
    Np = n_tiles * tile_n
    if needs_pad and Np != N:
        # TODO(synk): mask the ragged tail in-kernel instead of this extra HBM
        # copy of x (only hit when N has no clean multiple-of-8 divisor and
        # exceeds max_batch_tile).
        x2 = jnp.pad(x2, ((0, Np - N), (0, 0)))

    # VMEM budget: double-buffered x/out tiles + resident bf16 weights + f32
    # intermediates, with 2x headroom; floor 32 MiB, cap 64 MiB (v7x-safe).
    est = (2 * tile_n * D * 2
           + 2 * tile_n * Cp * 4
           + 2 * (D * Hp + Hp * Hp + Hp * Cp) * 2
           + 2 * (2 * Hp + Cp) * 4
           + 2 * tile_n * Hp * 4)
    vmem_limit = int(min(64 << 20, max(32 << 20, 2 * est)))

    out = pl.pallas_call(
        _mlp_fused_kernel,
        out_shape=jax.ShapeDtypeStruct((Np, Cp), jnp.float32),
        grid_spec=pltpu.PrefetchScalarGridSpec(
            num_scalar_prefetch=0,
            grid=(n_tiles,),
            in_specs=[
                pl.BlockSpec((tile_n, D), lambda i: (i, 0)),   # x tile
                pl.BlockSpec((D, Hp), lambda i: (0, 0)),       # W1
                pl.BlockSpec((1, Hp), lambda i: (0, 0)),       # b1
                pl.BlockSpec((Hp, Hp), lambda i: (0, 0)),      # W2
                pl.BlockSpec((1, Hp), lambda i: (0, 0)),       # b2
                pl.BlockSpec((Hp, Cp), lambda i: (0, 0)),      # W3
                pl.BlockSpec((1, Cp), lambda i: (0, 0)),       # b3
            ],
            out_specs=pl.BlockSpec((tile_n, Cp), lambda i: (i, 0)),
        ),
        compiler_params=pltpu.CompilerParams(
            dimension_semantics=("parallel",),
            vmem_limit_bytes=vmem_limit),
    )(x2, w1, b1, w2, b2, w3, b3)
    return out[:N, :num_classes]


# ----------------------------------------------------------------------------
# Deterministic parameter construction (PyTorch nn.Linear-style uniform init,
# weights stored transposed as (in_features, out_features)).
# ----------------------------------------------------------------------------
def init_params(key, input_dim, hidden_dim=64, num_classes=10):
    def linear(k, fan_in, fan_out):
        kw, kb = jax.random.split(k)
        bound = 1.0 / (fan_in ** 0.5)
        w = jax.random.uniform(kw, (fan_in, fan_out), jnp.float32,
                               minval=-bound, maxval=bound)
        b = jax.random.uniform(kb, (1, fan_out), jnp.float32,
                               minval=-bound, maxval=bound)
        return w, b

    k1, k2, k3 = jax.random.split(key, 3)
    w1, b1 = linear(k1, input_dim, hidden_dim)
    w2, b2 = linear(k2, hidden_dim, hidden_dim)
    w3, b3 = linear(k3, hidden_dim, num_classes)
    return {"w1": w1, "b1": b1, "w2": w2, "b2": b2, "w3": w3, "b3": b3}


# ----------------------------------------------------------------------------
# Pure-JAX references for correctness checking.
# ----------------------------------------------------------------------------
def _reference_f32(params, x):
    x2 = x.reshape(x.shape[0], -1)
    h = jnp.maximum(x2 @ params["w1"] + params["b1"], 0.0)
    h = jnp.maximum(h @ params["w2"] + params["b2"], 0.0)
    return h @ params["w3"] + params["b3"]


def _reference_bf16(params, x):
    # Mirrors the kernel's quantization: bf16 inputs/weights/activations,
    # f32 accumulation, f32 biases.
    bf = lambda a: a.astype(jnp.bfloat16).astype(jnp.float32)
    x2 = bf(x.reshape(x.shape[0], -1))
    h = jnp.maximum(x2 @ bf(params["w1"]) + params["b1"], 0.0)
    h = jnp.maximum(bf(h) @ bf(params["w2"]) + params["b2"], 0.0)
    return bf(h) @ bf(params["w3"]) + params["b3"]


if __name__ == "__main__":
    key = jax.random.PRNGKey(0)
    pkey, xkey = jax.random.split(key)

    # Input consistent with the module: batch=2, channels=4, spatial=16x16
    # -> x.view(N, -1) gives input_dim = 4*16*16 = 1024.
    N, Cch, Hs, Ws = 2, 4, 16, 16
    input_dim = Cch * Hs * Ws
    x = jax.random.normal(xkey, (N, Cch, Hs, Ws), jnp.float32)

    params = init_params(pkey, input_dim, hidden_dim=64, num_classes=10)
    prepared, num_classes = prepare_params(params)

    fwd = jax.jit(functools.partial(mlp_forward, prepared, num_classes))
    out = fwd(x)
    jax.block_until_ready(out)

    assert out.shape == (N, num_classes), out.shape
    assert out.dtype == jnp.float32

    # Tight check against a reference applying identical bf16 rounding.
    ref_bf16 = _reference_bf16(params, x)
    assert jnp.allclose(out, ref_bf16, atol=2e-3, rtol=2e-3), \
        float(jnp.max(jnp.abs(out - ref_bf16)))

    # Loose sanity check against full-f32 module semantics.
    ref_f32 = _reference_f32(params, x)
    assert jnp.allclose(out, ref_f32, atol=5e-2, rtol=5e-2), \
        float(jnp.max(jnp.abs(out - ref_f32)))

    print("KERNEL_OK")
</pallas_src>

<mosaic_0001>
module attributes {stable_mosaic.version = 11 : i64} {
  func.func @_mlp_fused_kernel(%arg0: i32, %arg1: memref<2x1024xbf16, #tpu.memory_space<vmem>>, %arg2: memref<1024x128xbf16, #tpu.memory_space<vmem>>, %arg3: memref<1x128xf32, #tpu.memory_space<vmem>>, %arg4: memref<128x128xbf16, #tpu.memory_space<vmem>>, %arg5: memref<1x128xf32, #tpu.memory_space<vmem>>, %arg6: memref<128x128xbf16, #tpu.memory_space<vmem>>, %arg7: memref<1x128xf32, #tpu.memory_space<vmem>>, %arg8: memref<2x128xf32, #tpu.memory_space<vmem>>) attributes {dimension_semantics = [#tpu.dimension_semantics<parallel>], iteration_bounds = array<i64: 1>, scalar_prefetch = 0 : i64, scratch_operands = 0 : i64, tpu.core_type = #tpu.core_type<tc>, window_params = [{transform_indices = @transform_0, window_bounds = array<i64: 2, 1024>}, {pipeline_mode = #tpu.pipeline_mode<synchronous>, transform_indices = @transform_1, window_bounds = array<i64: 1024, 128>}, {pipeline_mode = #tpu.pipeline_mode<synchronous>, transform_indices = @transform_2, window_bounds = array<i64: 1, 128>}, {pipeline_mode = #tpu.pipeline_mode<synchronous>, transform_indices = @transform_3, window_bounds = array<i64: 128, 128>}, {pipeline_mode = #tpu.pipeline_mode<synchronous>, transform_indices = @transform_4, window_bounds = array<i64: 1, 128>}, {pipeline_mode = #tpu.pipeline_mode<synchronous>, transform_indices = @transform_5, window_bounds = array<i64: 128, 128>}, {pipeline_mode = #tpu.pipeline_mode<synchronous>, transform_indices = @transform_6, window_bounds = array<i64: 1, 128>}, {transform_indices = @transform_7, window_bounds = array<i64: 2, 128>}]} {
    %c0 = arith.constant 0 : index
    %c0_0 = arith.constant 0 : index
    %0 = vector.load %arg1[%c0, %c0_0] : memref<2x1024xbf16, #tpu.memory_space<vmem>>, vector<2x1024xbf16>
    %c0_1 = arith.constant 0 : index
    %c0_2 = arith.constant 0 : index
    %1 = vector.load %arg2[%c0_1, %c0_2] : memref<1024x128xbf16, #tpu.memory_space<vmem>>, vector<1024x128xbf16>
    %cst = arith.constant dense<0.000000e+00> : vector<2x128xf32>
    %2 = tpu.matmul %0, %1, %cst {dimension_numbers = #tpu.dot_dimension_numbers<[1], [0], [0], [1], [0, 0, 1, 1], [], []>} : vector<2x1024xbf16>, vector<1024x128xbf16>, vector<2x128xf32> -> vector<2x128xf32>
    %c0_3 = arith.constant 0 : index
    %c0_4 = arith.constant 0 : index
    %3 = vector.load %arg3[%c0_3, %c0_4] : memref<1x128xf32, #tpu.memory_space<vmem>>, vector<1x128xf32>
    %4 = vector.broadcast %3 : vector<1x128xf32> to vector<2x128xf32>
    %5 = arith.addf %2, %4 : vector<2x128xf32>
    %cst_5 = arith.constant 0.000000e+00 : f32
    %6 = vector.broadcast %cst_5 : f32 to vector<2x128xf32>
    %7 = arith.maximumf %5, %6 : vector<2x128xf32>
    %8 = arith.truncf %7 : vector<2x128xf32> to vector<2x128xbf16>
    %c0_6 = arith.constant 0 : index
    %c0_7 = arith.constant 0 : index
    %9 = vector.load %arg4[%c0_6, %c0_7] : memref<128x128xbf16, #tpu.memory_space<vmem>>, vector<128x128xbf16>
    %cst_8 = arith.constant dense<0.000000e+00> : vector<2x128xf32>
    %10 = tpu.matmul %8, %9, %cst_8 {dimension_numbers = #tpu.dot_dimension_numbers<[1], [0], [0], [1], [0, 0, 1, 1], [], []>} : vector<2x128xbf16>, vector<128x128xbf16>, vector<2x128xf32> -> vector<2x128xf32>
    %c0_9 = arith.constant 0 : index
    %c0_10 = arith.constant 0 : index
    %11 = vector.load %arg5[%c0_9, %c0_10] : memref<1x128xf32, #tpu.memory_space<vmem>>, vector<1x128xf32>
    %12 = vector.broadcast %11 : vector<1x128xf32> to vector<2x128xf32>
    %13 = arith.addf %10, %12 : vector<2x128xf32>
    %cst_11 = arith.constant 0.000000e+00 : f32
    %14 = vector.broadcast %cst_11 : f32 to vector<2x128xf32>
    %15 = arith.maximumf %13, %14 : vector<2x128xf32>
    %16 = arith.truncf %15 : vector<2x128xf32> to vector<2x128xbf16>
    %c0_12 = arith.constant 0 : index
    %c0_13 = arith.constant 0 : index
    %17 = vector.load %arg6[%c0_12, %c0_13] : memref<128x128xbf16, #tpu.memory_space<vmem>>, vector<128x128xbf16>
    %cst_14 = arith.constant dense<0.000000e+00> : vector<2x128xf32>
    %18 = tpu.matmul %16, %17, %cst_14 {dimension_numbers = #tpu.dot_dimension_numbers<[1], [0], [0], [1], [0, 0, 1, 1], [], []>} : vector<2x128xbf16>, vector<128x128xbf16>, vector<2x128xf32> -> vector<2x128xf32>
    %c0_15 = arith.constant 0 : index
    %c0_16 = arith.constant 0 : index
    %19 = vector.load %arg7[%c0_15, %c0_16] : memref<1x128xf32, #tpu.memory_space<vmem>>, vector<1x128xf32>
    %20 = vector.broadcast %19 : vector<1x128xf32> to vector<2x128xf32>
    %21 = arith.addf %18, %20 : vector<2x128xf32>
    %c0_17 = arith.constant 0 : index
    %c0_18 = arith.constant 0 : index
    %22 = vector.load %arg8[%c0_17, %c0_18] : memref<2x128xf32, #tpu.memory_space<vmem>>, vector<2x128xf32>
    tpu.vector_store %arg8[%c0_17, %c0_18], %21 {strides = array<i32>} : memref<2x128xf32, #tpu.memory_space<vmem>>, vector<2x128xf32>,
    return
  }
  func.func @transform_0(%arg0: i32) -> (i32, i32) {
    %c0_i32 = arith.constant 0 : i32
    %c0_i32_0 = arith.constant 0 : i32
    return %arg0, %c0_i32 : i32, i32
  }
  func.func @transform_1(%arg0: i32) -> (i32, i32) {
    %c0_i32 = arith.constant 0 : i32
    %c0_i32_0 = arith.constant 0 : i32
    %c0_i32_1 = arith.constant 0 : i32
    return %c0_i32, %c0_i32_0 : i32, i32
  }
  func.func @transform_2(%arg0: i32) -> (i32, i32) {
    %c0_i32 = arith.constant 0 : i32
    %c0_i32_0 = arith.constant 0 : i32
    %c0_i32_1 = arith.constant 0 : i32
    return %c0_i32, %c0_i32_0 : i32, i32
  }
  func.func @transform_3(%arg0: i32) -> (i32, i32) {
    %c0_i32 = arith.constant 0 : i32
    %c0_i32_0 = arith.constant 0 : i32
    %c0_i32_1 = arith.constant 0 : i32
    return %c0_i32, %c0_i32_0 : i32, i32
  }
  func.func @transform_4(%arg0: i32) -> (i32, i32) {
    %c0_i32 = arith.constant 0 : i32
    %c0_i32_0 = arith.constant 0 : i32
    %c0_i32_1 = arith.constant 0 : i32
    return %c0_i32, %c0_i32_0 : i32, i32
  }
  func.func @transform_5(%arg0: i32) -> (i32, i32) {
    %c0_i32 = arith.constant 0 : i32
    %c0_i32_0 = arith.constant 0 : i32
    %c0_i32_1 = arith.constant 0 : i32
    return %c0_i32, %c0_i32_0 : i32, i32
  }
  func.func @transform_6(%arg0: i32) -> (i32, i32) {
    %c0_i32 = arith.constant 0 : i32
    %c0_i32_0 = arith.constant 0 : i32
    %c0_i32_1 = arith.constant 0 : i32
    return %c0_i32, %c0_i32_0 : i32, i32
  }
  func.func @transform_7(%arg0: i32) -> (i32, i32) {
    %c0_i32 = arith.constant 0 : i32
    %c0_i32_0 = arith.constant 0 : i32
    return %arg0, %c0_i32 : i32, i32
  }
}

</mosaic_0001>

<bundles_post_ra>
// kernel: mlp_forward.1
= control target key start
LH: loop header
LB: loop body
LE: loop exit
PB: predicated region body
PF: predicated region fallthrough
CT: control target
= control target key end

     0   :  { %12 = vsyncpa [#allocation3], 0  ;;  %s1527_s0 = inlined_call_operand.vmem [shape: bf16[2,1024], index: 0, kind: input, shape index: {}]   ;;  %s1528_s1 = inlined_call_operand.hbm [shape: bf16[1024,128], index: 1, kind: input, shape index: {}]   ;;  %s1529_s2 = inlined_call_operand.vmem [shape: f32[1,128], index: 2, kind: input, shape index: {}]   ;;  %s1530_s3 = inlined_call_operand.vmem [shape: bf16[128,128], index: 3, kind: input, shape index: {}]   ;;  %s1531_s4 = inlined_call_operand.vmem [shape: f32[1,128], index: 4, kind: input, shape index: {}]   ;;  %s1532_s5 = inlined_call_operand.vmem [shape: bf16[128,128], index: 5, kind: input, shape index: {}]   ;;  %s1533_s6 = inlined_call_operand.vmem [shape: f32[1,128], index: 6, kind: input, shape index: {}]   ;;  %s1534_s7 = inlined_call_operand.hbm [shape: f32[2,128], index: 7, kind: output, shape index: {}]  }
   0x1   :  { %13 = vsyncpa [#allocation4], 0  ;;  %s1383_s24 = smov [#allocation2]  }
   0x2   :  { %s21_s25 = sshll.u32 %s1383_s24, 4  ;;  %s22_s25 = int_to_ptr.vmem [resolvable:$true] %s21_s25 }
   0x3   :  { %s1347_s26 = scalar_lea.vmem %s22_s25, 8192  ;;  %p1352_p1 = scmp.lt.s32.totalorder %s22_s25, %s22_s25 }
   0x4   :  { %p1348_p0 = scmp.ne.s32.totalorder %s22_s25, %s1347_s26  ;;  %p1353_p2 = scmp.lt.s32.totalorder %s1347_s26, %s1347_s26 }
   0x6   :  { %p1354_p3 = por %p1353_p2, %p1352_p1 }
   0x8   :  { %p1355_p4 = pnand %p1354_p3, %p1348_p0 }
   0xa   :  { %1358 = shalt.err (!%p1355_p4)
}
   0xb   :  { %s1384_s27 = smov 64   ;;  %s1385_s28 = smov 4  }
   0xc   :  { %27 = dma.hbm_to_vmem [thread:$0]  %s1528_s1, 8192, %s22_s25, [#allocation3], %s1384_s27, %s1384_s27, %s1385_s28  }
   0xd   :  { %1379 = dma.done.wait [#allocation3], 8192  }
   0xe   :  { %1380 = vsyncadd [#allocation3], 4294959104  ;;  %v1258_v0 = vld [vmem:[#allocation2 + $0x78] sm:$0xff]   ;;  %v1262_v4 = vld [vmem:[#allocation2 + $0x70] sm:$0xff]   ;;  %v1386_v22 = vmov 1966171168   ;;  %v183_v24 = vlaneseq }
   0xf   :  { %v1259_v1 = vld [vmem:[#allocation2 + $0xf8] sm:$0xff]   ;;  %1105 = vmatprep.subr.bf16.mxu0 %v1258_v0  ;;  %v1263_v5 = vld [vmem:[#allocation2 + $0xf0] sm:$0xff]   ;;  %v1266_v8 = vld [vmem:[#allocation2 + $0x68] sm:$0xff]   ;;  %v181_v23 = vunpack.c.l.s4 %v1386_v22  ;;  %vm1388_vm0 = vmmov 0   ;;  %s1389_s19 = smov [#allocation5]  }
  0x10   :  { %v1260_v2 = vld [vmem:[#allocation2 + $0x38] sm:$0xff]   ;;  %1127 = vmatprep.subr.bf16.mxu1 %v1259_v1  ;;  %v1264_v6 = vld [vmem:[#allocation2 + $0x30] sm:$0xff]   ;;  %v1267_v9 = vld [vmem:[#allocation2 + $0xe8] sm:$0xff]   ;;  %v184_v30 = vshrl.u32 %v183_v24, 7  ;;  %s1013_s20 = sshll.u32 %s1389_s19, 4  ;;  %s1014_s20 = int_to_ptr.vmem [resolvable:$true] %s1013_s20 }
  0x11   :  { %v1261_v3 = vld [vmem:[#allocation2 + $0xb8] sm:$0xff]   ;;  %1106 = vmatpush3.bf16.msra.mxu0 %v1260_v2  ;;  %v1265_v7 = vld [vmem:[#allocation2 + $0xb0] sm:$0xff]   ;;  %v1268_v10 = vld [vmem:[#allocation2 + $0x28] sm:$0xff]   ;;  %v182_v29 = vunpack.c.0.s8 %v181_v23  ;;  %p1364_p6 = scmp.lt.s32.totalorder %s1014_s20, %s1014_s20 }
  0x12   :  { %1128 = vmatpush3.bf16.msra.mxu1 %v1261_v3  ;;  %1107 = vmatprep.subr.bf16.mxu0 %v1262_v4  ;;  %v1269_v11 = vld [vmem:[#allocation2 + $0xa8] sm:$0xff]   ;;  %v1270_v12 = vld [vmem:[#allocation2 + $0x60] sm:$0xff]   ;;  %v1274_v16 = vld [vmem:[#allocation2 + $0x58] sm:$0xff]  }
  0x13   :  { %1129 = vmatprep.subr.bf16.mxu1 %v1263_v5  ;;  %v1271_v13 = vld [vmem:[#allocation2 + $0xe0] sm:$0xff]   ;;  %v1275_v17 = vld [vmem:[#allocation2 + $0xd8] sm:$0xff]   ;;  %v1278_v20 = vld [vmem:[#allocation2 + $0x50] sm:$0xff]   ;;  %v1433_v35 = vsub.s32 %v182_v29, %v184_v30 }
  0x14   :  { %v1272_v14 = vld [vmem:[#allocation2 + $0x20] sm:$0xff]   ;;  %v1276_v18 = vld [vmem:[#allocation2 + $0x18] sm:$0xff]   ;;  %v1279_v21 = vld [vmem:[#allocation2 + $0xd0] sm:$0xff]  }
  0x15   :  { %1108 = vmatpush3.bf16.msra.mxu0 %v1264_v6  ;;  %v1273_v15 = vld [vmem:[#allocation2 + $0xa0] sm:$0xff]   ;;  %v1277_v19 = vld [vmem:[#allocation2 + $0x98] sm:$0xff]   ;;  %v1280_v25 = vld [vmem:[#allocation2 + $0x10] sm:$0xff]  }
  0x16   :  { %1130 = vmatpush3.bf16.msra.mxu1 %v1265_v7  ;;  %1109 = vmatprep.subr.bf16.mxu0 %v1266_v8  ;;  %v1281_v26 = vld [vmem:[#allocation2 + $0x90] sm:$0xff]   ;;  %v1282_v27 = vld [vmem:[#allocation2 + $0x48] sm:$0xff]   ;;  %v1286_v33 = vld [vmem:[#allocation2 + $0x40] sm:$0xff]  }
  0x17   :  { %1131 = vmatprep.subr.bf16.mxu1 %v1267_v9  ;;  %v1283_v28 = vld [vmem:[#allocation2 + $0xc8] sm:$0xff]   ;;  %v1287_v34 = vld [vmem:[#allocation2 + $0xc0] sm:$0xff]   ;;  %v1291_v41 = vld [vmem:[#allocation2 + $0x178] sm:$0xff]  }
  0x18   :  { %v1284_v31 = vld [vmem:[#allocation2 + $0x8] sm:$0xff]   ;;  %v1288_v36 = vld [vmem:[#allocation2] sm:$0xff]   ;;  %v1292_v42 = vld [vmem:[#allocation2 + $0x1f8] sm:$0xff]  }
  0x19   :  { %1110 = vmatpush3.bf16.msra.mxu0 %v1268_v10  ;;  %v1285_v32 = vld [vmem:[#allocation2 + $0x88] sm:$0xff]   ;;  %v1289_v37 = vld [vmem:[#allocation2 + $0x80] sm:$0xff]   ;;  %v1293_v46 = vld [vmem:[#allocation2 + $0x138] sm:$0xff]  }
  0x1a   :  { %1132 = vmatpush3.bf16.msra.mxu1 %v1269_v11  ;;  %1111 = vmatprep.subr.bf16.mxu0 %v1270_v12  ;;  %v42_v38 = vld [vmem:[%s1527_s0] sm:$0xff]  ;;  %v1294_v48 = vld [vmem:[#allocation2 + $0x1b8] sm:$0xff]   ;;  %v1295_v51 = vld [vmem:[#allocation2 + $0x170] sm:$0xff]  }
  0x1b   :  { %1133 = vmatprep.subr.bf16.mxu1 %v1271_v13  ;;  %v179_v39 = vcombine.high %v42_v38, %v42_v38  ;;  %v186_v40 = vrot.slane %v42_v38, %v1433_v35  ;;  %v1296_v53 = vld [vmem:[#allocation2 + $0x1f0] sm:$0xff]   ;;  %v1299_v58 = vld [vmem:[#allocation2 + $0x168] sm:$0xff]   ;;  %v1303_v62 = vld [vmem:[#allocation2 + $0x160] sm:$0xff]  }
  0x1c   :  { %v1297_v55 = vld [vmem:[#allocation2 + $0x130] sm:$0xff]   ;;  %v1300_v59 = vld [vmem:[#allocation2 + $0x1e8] sm:$0xff]   ;;  %v1304_v63 = vld [vmem:[#allocation2 + $0x1e0] sm:$0xff]  }
  0x1d   :  { %1112 = vmatpush3.bf16.msra.mxu0 %v1272_v14  ;;  %v194_v43 = vcombine.high %v186_v40, %v186_v40  ;;  %v202_v44 = vrot.slane %v186_v40, %v1433_v35  ;;  %v1441_v45 = vrot.slane %v179_v39, %v1433_v35  ;;  %v1298_v56 = vld [vmem:[#allocation2 + $0x1b0] sm:$0xff]   ;;  %v1301_v60 = vld [vmem:[#allocation2 + $0x128] sm:$0xff]   ;;  %v1305_v0 = vld [vmem:[#allocation2 + $0x120] sm:$0xff]  }
  0x1e   :  { %1134 = vmatpush3.bf16.msra.mxu1 %v1273_v15  ;;  %1113 = vmatprep.subr.bf16.mxu0 %v1274_v16  ;;  %v1302_v61 = vld [vmem:[#allocation2 + $0x1a8] sm:$0xff]   ;;  %v1306_v1 = vld [vmem:[#allocation2 + $0x1a0] sm:$0xff]   ;;  %v1307_v2 = vld [vmem:[#allocation2 + $0x158] sm:$0xff]  }
  0x1f   :  { %1135 = vmatprep.subr.bf16.mxu1 %v1275_v17  ;;  %v216_v47 = vrot.slane %v194_v43, %v1433_v35  ;;  %v195_v49 = vcombine.high %v1441_v45, %v1441_v45  ;;  %v224_v50 = vcombine.high %v202_v44, %v202_v44  ;;  %v1308_v3 = vld [vmem:[#allocation2 + $0x1d8] sm:$0xff]   ;;  %v1311_v6 = vld [vmem:[#allocation2 + $0x150] sm:$0xff]   ;;  %v1315_v10 = vld [vmem:[#allocation2 + $0x148] sm:$0xff]  }
  0x20   :  { %v1309_v4 = vld [vmem:[#allocation2 + $0x118] sm:$0xff]   ;;  %v1312_v7 = vld [vmem:[#allocation2 + $0x1d0] sm:$0xff]   ;;  %v1316_v11 = vld [vmem:[#allocation2 + $0x1c8] sm:$0xff]  }
  0x21   :  { %1114 = vmatpush3.bf16.msra.mxu0 %v1276_v18  ;;  %652 = vmatprep.mubr.bf16.mxu0 %v216_v47  ;;  %v226_v52 = vcombine.high %v216_v47, %v216_v47  ;;  %v223_v54 = vrot.slane %v195_v49, %v1433_v35  ;;  %v1310_v5 = vld [vmem:[#allocation2 + $0x198] sm:$0xff]   ;;  %v1313_v8 = vld [vmem:[#allocation2 + $0x110] sm:$0xff]   ;;  %v1317_v12 = vld [vmem:[#allocation2 + $0x108] sm:$0xff]   ;;  %v209_v18 = vrot.slane %v1441_v45, %v1433_v35 }
  0x22   :  { %1136 = vmatpush3.bf16.msra.mxu1 %v1277_v19  ;;  %1115 = vmatprep.subr.bf16.mxu0 %v1278_v20  ;;  %v1314_v9 = vld [vmem:[#allocation2 + $0x190] sm:$0xff]   ;;  %v1318_v13 = vld [vmem:[#allocation2 + $0x188] sm:$0xff]   ;;  %v1319_v14 = vld [vmem:[#allocation2 + $0x140] sm:$0xff]  }
  0x23   :  { %1137 = vmatprep.subr.bf16.mxu1 %v1279_v21  ;;  %692 = vmatprep.mubr.bf16.mxu1 %v226_v52  ;;  %v227_v57 = vcombine.high %v223_v54, %v223_v54  ;;  %v1320_v15 = vld [vmem:[#allocation2 + $0x1c0] sm:$0xff]   ;;  %v225_v19 = vcombine.high %v209_v18, %v209_v18  ;;  %v1323_v20 = vld [vmem:[%s1530_s3 + $0x38] sm:$0xff]   ;;  %v1387_v21 = vmov 0.0   ;;  %v1324_v22 = vld [vmem:[%s1530_s3 + $0x30] sm:$0xff]  }
  0x24   :  { %v1321_v16 = vld [vmem:[#allocation2 + $0x100] sm:$0xff]   ;;  %v1325_v23 = vld [vmem:[%s1530_s3 + $0x28] sm:$0xff]   ;;  %v1331_v29 = vld [vmem:[%s1532_s5 + $0x38] sm:$0xff]  }
  0x25   :  { %1116 = vmatpush3.bf16.msra.mxu0 %v1280_v25  ;;  %v1322_v17 = vld [vmem:[#allocation2 + $0x180] sm:$0xff]   ;;  %v1327_v25 = vld [vmem:[%s1530_s3 + $0x18] sm:$0xff]   ;;  %v1332_v30 = vld [vmem:[%s1532_s5 + $0x30] sm:$0xff]  }
  0x26   :  { %1138 = vmatpush3.bf16.msra.mxu1 %v1281_v26  ;;  %1117 = vmatprep.subr.bf16.mxu0 %v1282_v27  ;;  %v1326_v24 = vld [vmem:[%s1530_s3 + $0x20] sm:$0xff]   ;;  %v1328_v26 = vld [vmem:[%s1530_s3 + $0x10] sm:$0xff]   ;;  %v1329_v27 = vld [vmem:[%s1530_s3 + $0x8] sm:$0xff]  }
  0x27   :  { %1139 = vmatprep.subr.bf16.mxu1 %v1283_v28  ;;  %v1330_v28 = vld [vmem:[%s1530_s3] sm:$0xff]  }
  0x29   :  { %1118 = vmatpush3.bf16.msra.mxu0 %v1284_v31  ;;  %v1333_v31 = vld [vmem:[%s1532_s5 + $0x28] sm:$0xff]  }
  0x2a   :  { %1140 = vmatpush3.bf16.msra.mxu1 %v1285_v32  ;;  %1119 = vmatprep.subr.bf16.mxu0 %v1286_v33  ;;  %v1334_v32 = vld [vmem:[%s1532_s5 + $0x20] sm:$0xff]   ;;  %v1335_v33 = vld [vmem:[%s1532_s5 + $0x18] sm:$0xff]  }
  0x2b   :  { %1141 = vmatprep.subr.bf16.mxu1 %v1287_v34  ;;  %v1336_v34 = vld [vmem:[%s1532_s5 + $0x10] sm:$0xff]  }
  0x2d   :  { %1120 = vmatpush3.bf16.msra.mxu0 %v1288_v36 }
  0x2e   :  { %1142 = vmatpush3.bf16.msra.mxu1 %v1289_v37  ;;  %1149 = vmatprep.subr.bf16.mxu0 %v1291_v41 }
  0x2f   :  { %1171 = vmatprep.subr.bf16.mxu1 %v1292_v42 }
  0x30   :  { %653 = vmatmul.mubr.bf16.vlgmr.msra.gmra.mxu0 %v202_v44  ;;  %v1022_v44 = vld [vmem:[%s1529_s2] ss:$0 sm:$0xff] }
  0x31   :  { %1150 = vmatpush3.bf16.msra.mxu0 %v1293_v46  ;;  %693 = vmatmul.mubr.bf16.vlgmr.msra.gmra.mxu1 %v224_v50 }
  0x32   :  { %1151 = vmatprep.subr.bf16.mxu0 %v1295_v51  ;;  %1172 = vmatpush3.bf16.msra.mxu1 %v1294_v48 }
  0x33   :  { %732 = vmatprep.mubr.bf16.mxu0 %v223_v54  ;;  %1173 = vmatprep.subr.bf16.mxu1 %v1296_v53 }
  0x34   :  { %772 = vmatprep.mubr.bf16.mxu1 %v227_v57 }
  0x35   :  { %1152 = vmatpush3.bf16.msra.mxu0 %v1297_v55 }
  0x36   :  { %1153 = vmatprep.subr.bf16.mxu0 %v1299_v58  ;;  %1174 = vmatpush3.bf16.msra.mxu1 %v1298_v56 }
  0x37   :  { %1175 = vmatprep.subr.bf16.mxu1 %v1300_v59 }
  0x39   :  { %1154 = vmatpush3.bf16.msra.mxu0 %v1301_v60 }
  0x3a   :  { %1155 = vmatprep.subr.bf16.mxu0 %v1303_v62  ;;  %1176 = vmatpush3.bf16.msra.mxu1 %v1302_v61  ;;  %v1337_v62 = vld [vmem:[%s1532_s5 + $0x8] sm:$0xff]  }
  0x3b   :  { %1177 = vmatprep.subr.bf16.mxu1 %v1304_v63  ;;  %v1338_v63 = vld [vmem:[%s1532_s5] sm:$0xff]  }
  0x3d   :  { %1156 = vmatpush3.bf16.msra.mxu0 %v1305_v0  ;;  %v1087_v0 = vld [vmem:[%s1531_s4] ss:$0 sm:$0xff]  ;;  %s1359_s4 = scalar_lea.vmem %s1014_s20, 32 }
  0x3e   :  { %1157 = vmatprep.subr.bf16.mxu0 %v1307_v2  ;;  %1178 = vmatpush3.bf16.msra.mxu1 %v1306_v1  ;;  %p1360_p5 = scmp.ne.s32.totalorder %s1014_s20, %s1359_s4  ;;  %p1365_p7 = scmp.lt.s32.totalorder %s1359_s4, %s1359_s4 }
  0x3f   :  { %1179 = vmatprep.subr.bf16.mxu1 %v1308_v3 }
  0x40   :  { %p1366_p8 = por %p1365_p7, %p1364_p6 }
  0x41   :  { %1158 = vmatpush3.bf16.msra.mxu0 %v1309_v4 }
  0x42   :  { %1159 = vmatprep.subr.bf16.mxu0 %v1311_v6  ;;  %1180 = vmatpush3.bf16.msra.mxu1 %v1310_v5  ;;  %p1367_p9 = pnand %p1366_p8, %p1360_p5 }
  0x43   :  { %1181 = vmatprep.subr.bf16.mxu1 %v1312_v7 }
  0x45   :  { %1160 = vmatpush3.bf16.msra.mxu0 %v1313_v8  ;;  %v1096_v8 = vld [vmem:[%s1533_s6] ss:$0 sm:$0xff] }
  0x46   :  { %1161 = vmatprep.subr.bf16.mxu0 %v1315_v10  ;;  %1182 = vmatpush3.bf16.msra.mxu1 %v1314_v9 }
  0x47   :  { %1183 = vmatprep.subr.bf16.mxu1 %v1316_v11 }
  0x49   :  { %1162 = vmatpush3.bf16.msra.mxu0 %v1317_v12 }
  0x4a   :  { %1163 = vmatprep.subr.bf16.mxu0 %v1319_v14  ;;  %1184 = vmatpush3.bf16.msra.mxu1 %v1318_v13 }
  0x4b   :  { %1185 = vmatprep.subr.bf16.mxu1 %v1320_v15 }
  0x4d   :  { %1164 = vmatpush3.bf16.msra.mxu0 %v1321_v16 }
  0x4e   :  { %1186 = vmatpush3.bf16.msra.mxu1 %v1322_v17  ;;  %1211 = vmatprep.subr.bf16.mxu0 %v1387_v21 }
  0x4f   :  { %1231 = vmatprep.subr.bf16.mxu1 %v1387_v21 }
  0x50   :  { %733 = vmatmul.mubr.bf16.vlgmr.msra.gmra.mxu0 %v209_v18 }
  0x51   :  { %773 = vmatmul.mubr.bf16.vlgmr.msra.gmra.mxu1 %v225_v19  ;;  %1212 = vmatpush3.bf16.msra.mxu0 %v1323_v20 }
  0x52   :  { %1213 = vmatprep.subr.bf16.mxu0 %v1387_v21  ;;  %1227 = vmatprep.mubr.msk.bf16.mxu0 %vm1388_vm0, %v1387_v21 }
  0x53   :  { %1247 = vmatprep.mubr.msk.bf16.mxu1 %vm1388_vm0, %v1387_v21  ;;  %1232 = vmatpush3.bf16.msra.mxu1 %v1331_v29 }
  0x54   :  { %1233 = vmatprep.subr.bf16.mxu1 %v1387_v21 }
  0x55   :  { %1214 = vmatpush3.bf16.msra.mxu0 %v1324_v22 }
  0x56   :  { %1215 = vmatprep.subr.bf16.mxu0 %v1387_v21 }
  0x57   :  { %1234 = vmatpush3.bf16.msra.mxu1 %v1332_v30 }
  0x58   :  { %1235 = vmatprep.subr.bf16.mxu1 %v1387_v21 }
  0x59   :  { %1216 = vmatpush3.bf16.msra.mxu0 %v1325_v23 }
  0x5a   :  { %1217 = vmatprep.subr.bf16.mxu0 %v1387_v21 }
  0x5b   :  { %1236 = vmatpush3.bf16.msra.mxu1 %v1333_v31 }
  0x5c   :  { %1237 = vmatprep.subr.bf16.mxu1 %v1387_v21 }
  0x5d   :  { %1218 = vmatpush3.bf16.msra.mxu0 %v1326_v24 }
  0x5e   :  { %1219 = vmatprep.subr.bf16.mxu0 %v1387_v21 }
  0x5f   :  { %1238 = vmatpush3.bf16.msra.mxu1 %v1334_v32 }
  0x60   :  { %1239 = vmatprep.subr.bf16.mxu1 %v1387_v21 }
  0x61   :  { %1220 = vmatpush3.bf16.msra.mxu0 %v1327_v25 }
  0x62   :  { %1221 = vmatprep.subr.bf16.mxu0 %v1387_v21 }
  0x63   :  { %1240 = vmatpush3.bf16.msra.mxu1 %v1335_v33 }
  0x64   :  { %1241 = vmatprep.subr.bf16.mxu1 %v1387_v21 }
  0x65   :  { %1222 = vmatpush3.bf16.msra.mxu0 %v1328_v26 }
  0x66   :  { %1223 = vmatprep.subr.bf16.mxu0 %v1387_v21 }
  0x67   :  { %1242 = vmatpush3.bf16.msra.mxu1 %v1336_v34 }
  0x68   :  { %1243 = vmatprep.subr.bf16.mxu1 %v1387_v21 }
  0x69   :  { %1224 = vmatpush3.bf16.msra.mxu0 %v1329_v27 }
  0x6a   :  { %1225 = vmatprep.subr.bf16.mxu0 %v1387_v21 }
  0x6b   :  { %1244 = vmatpush3.bf16.msra.mxu1 %v1337_v62 }
  0x6c   :  { %1245 = vmatprep.subr.bf16.mxu1 %v1387_v21 }
  0x6d   :  { %1226 = vmatpush3.bf16.msra.mxu0 %v1330_v28 }
  0x6f   :  { %1246 = vmatpush3.bf16.msra.mxu1 %v1338_v63 }
  0xf0   :  { %v1121_v35 = vpop.f32.mrf.mxu0 }
  0xf1   :  { %v1143_v36 = vpop.f32.mrf.mxu1 }
  0xf2   :  { %v1122_v37 = vpop.f32.mrf.mxu0 }
  0xf3   :  { %v1144_v38 = vpop.f32.mrf.mxu1  ;;  %v1123_v43 = vadd.f32 %v1122_v37, %v1121_v35 }
  0xf4   :  { %v1124_v39 = vpop.f32.mrf.mxu0  ;;  %v1145_v46 = vadd.f32 %v1144_v38, %v1143_v36 }
  0xf5   :  { %v1146_v40 = vpop.f32.mrf.mxu1  ;;  %v655_v45 = vadd.f32 %v1123_v43, %v1022_v44 }
  0xf6   :  { %v1125_v41 = vpop.f32.mrf.mxu0 }
  0xf7   :  { %v1147_v42 = vpop.f32.mrf.mxu1  ;;  %v695_v50 = vadd.f32 %v1145_v46, %v655_v45 }
 0x110   :  { %v1165_v47 = vpop.f32.mrf.mxu0 }
 0x111   :  { %v1187_v48 = vpop.f32.mrf.mxu1 }
 0x112   :  { %v1166_v49 = vpop.f32.mrf.mxu0 }
 0x113   :  { %v1167_v51 = vadd.f32 %v1166_v49, %v1165_v47  ;;  %v1188_v52 = vpop.f32.mrf.mxu1 }
 0x114   :  { %v1168_v53 = vpop.f32.mrf.mxu0  ;;  %v1189_v55 = vadd.f32 %v1188_v52, %v1187_v48 }
 0x115   :  { %v735_v54 = vadd.f32 %v1167_v51, %v695_v50  ;;  %v1190_v56 = vpop.f32.mrf.mxu1 }
 0x116   :  { %v1169_v57 = vpop.f32.mrf.mxu0 }
 0x117   :  { %v775_v58 = vadd.f32 %v1189_v55, %v735_v54  ;;  %v1191_v59 = vpop.f32.mrf.mxu1 }
 0x119   :  { %v780_v60 = vmax.f32 %v775_v58, 0.0 }
 0x11b   :  { %v781_v61 = vpack.c.bf16 %v780_v60, %v780_v60 }
 0x11d   :  { %1228 = vmatmul.mubr.bf16.vlgmr.msra.gmra.mxu0 %v781_v61 }
 0x1dd   :  { %v887_v1 = vpop.f32.mrf.mxu0 }
 0x1de   :  { %v888_v2 = vadd.f32 %v1087_v0, %v887_v1 }
 0x1df   :  { %v1229_v3 = vpop.f32.mrf.mxu0 }
 0x1e0   :  { %v893_v4 = vmax.f32 %v888_v2, 0.0 }
 0x1e1   :  { %v890_v5 = vpop.f32.mrf.mxu0 }
 0x1e2   :  { %v894_v6 = vpack.c.bf16 %v893_v4, %v893_v4 }
 0x1e3   :  { %v1230_v7 = vpop.f32.mrf.mxu0 }
 0x1e4   :  { %1248 = vmatmul.mubr.bf16.vlgmr.msra.gmra.mxu1 %v894_v6 }
 0x2a4   :  { %v1000_v9 = vpop.f32.mrf.mxu1 }
 0x2a5   :  { %v1001_v10 = vadd.f32 %v1096_v8, %v1000_v9 }
 0x2a6   :  { %v1249_v11 = vpop.f32.mrf.mxu1 }
 0x2a7   :  { %1006 = vst [vmem:[#allocation5] sm:$0x3] %v1001_v10 }
 0x2a8   :  { %v1003_v12 = vpop.f32.mrf.mxu1 }
 0x2a9   :  { %1370 = shalt.err (!%p1367_p9)
}
 0x2aa   :  { %1016 = dma.vmem_to_hbm [thread:$0]  %s1014_s20, 32, %s1534_s7, [#allocation4]   ;;  %v1250_v13 = vpop.f32.mrf.mxu1 }
 0x2ab   :  { %1381 = dma.done.wait [#allocation4], 32  }
 0x2ac   :  { %1382 = vsyncadd [#allocation4], 4294967264 }
 0x2ad   :  { %1020 = vsyncpa [#allocation3], 1 }
 0x2ae   :  { %1021 = vsyncpa [#allocation4], 1 }

</bundles_post_ra>
